<compile_context>
chip_gen: v7x
topology: tpu7x:2x2x1
jax: 0.10.0
libtpu: 0.0.40
codegen_flags: <defaults>
</compile_context>

<pallas_src>
import jax
import jax.numpy as jnp
from jax.experimental import pallas as pl
from jax.experimental.pallas import tpu as pltpu

NEG_SLOPE = 0.01   # torch.nn.LeakyReLU default negative_slope
BN_EPS = 1e-5      # torch.nn.BatchNorm1d default eps
LANE = 128         # TPU lane width


def _ceil_to(v, m):
    return ((v + m - 1) // m) * m


def _make_kernel(n_nodes, n_edges, n_classes):
    """Builds the fused kernel with the *real* (unpadded) sizes closed over."""

    def kernel(eps_ref,                                   # SMEM [2] f32
               src_ref, dst_ref, bat_ref,                 # VMEM int32 index vectors
               x_ref, ea_ref,                             # VMEM graph tensors
               we1_ref, be1_ref, w1_ref, b1_ref, g1_ref, bt1_ref,
               we2_ref, be2_ref, w2_ref, b2_ref, g2_ref, bt2_ref,
               wl_ref, bl_ref,
               out_ref):
        f32 = jnp.float32
        n_p = x_ref.shape[0]       # padded node count
        e_p = ea_ref.shape[0]      # padded edge count
        g_p = out_ref.shape[0]     # padded graph count

        # ---- one-hot gather / scatter / pool operators (built once, reused) ----
        # Gather x[src[e]]: S_src[e, n] = [src[e] == n]  (padded edges are harmless;
        # their contribution is killed by the masked scatter below).
        s_src = (jax.lax.broadcasted_iota(jnp.int32, (e_p, n_p), 1)
                 == src_ref[...]).astype(f32)                              # [Ep, Np]
        # Scatter-add into dst: S_dstT[n, e] = [dst[e] == n] AND [e < E].
        dst_hit = (jax.lax.broadcasted_iota(jnp.int32, (n_p, e_p), 0)
                   == dst_ref[...])
        edge_valid = jax.lax.broadcasted_iota(jnp.int32, (n_p, e_p), 1) < n_edges
        s_dst_t = (dst_hit & edge_valid).astype(f32)                       # [Np, Ep]
        # global_add_pool: P[g, n] = [batch[n] == g] AND [n < N].  The node-valid
        # mask is required because padded rows of x1/x2 are NOT zero
        # (bias + BN-of-bias + LeakyReLU leaks into them).
        pool_hit = (jax.lax.broadcasted_iota(jnp.int32, (g_p, n_p), 0)
                    == bat_ref[...])
        node_valid = jax.lax.broadcasted_iota(jnp.int32, (g_p, n_p), 1) < n_nodes
        pool = (pool_hit & node_valid).astype(f32)                         # [Gp, Np]

        ea = ea_ref[...]                                                   # [Ep, 1]

        # Node-row mask for BatchNorm statistics (hoisted, reused by both convs).
        node_mask = (jax.lax.broadcasted_iota(jnp.int32, (n_p, 1), 0)
                     < n_nodes).astype(f32)                                # [Np, 1]
        inv_n = 1.0 / float(n_nodes)

        def bn_lrelu(z, gamma, beta):
            # BatchNorm1d (training mode, biased variance) over the real N rows only,
            # then LeakyReLU.  Padded feature columns are all-zero -> stay zero.
            zm = z * node_mask
            mean = jnp.sum(zm, axis=0, keepdims=True) * inv_n
            cent = (z - mean) * node_mask
            var = jnp.sum(cent * cent, axis=0, keepdims=True) * inv_n
            zhat = (z - mean) * jax.lax.rsqrt(var + BN_EPS)
            y = zhat * gamma + beta
            return jnp.where(y >= 0.0, y, NEG_SLOPE * y)

        def gine_conv(xin, we, be, w, b, gamma, beta, eps):
            # edge embedding Linear(1, F): in_dim == 1 -> broadcast multiply-add.
            edge_emb = ea * we + be                                        # [Ep, 128]
            x_src = jnp.dot(s_src, xin, preferred_element_type=f32)        # MXU gather
            msg = jnp.maximum(x_src + edge_emb, 0.0)                       # relu message
            agg = jnp.dot(s_dst_t, msg, preferred_element_type=f32)        # MXU scatter-sum
            h = (1.0 + eps) * xin + agg
            z = jnp.dot(h, w, preferred_element_type=f32) + b
            return bn_lrelu(z, gamma, beta)                                # Dropout(0) == id

        x0 = x_ref[...]
        x1 = gine_conv(x0, we1_ref[...], be1_ref[...], w1_ref[...], b1_ref[...],
                       g1_ref[...], bt1_ref[...], eps_ref[0])   # non-zero lanes 0:H1
        x2 = gine_conv(x1, we2_ref[...], be2_ref[...], w2_ref[...], b2_ref[...],
                       g2_ref[...], bt2_ref[...], eps_ref[1])   # non-zero lanes H1:H1+H2

        # x1 / x2 occupy disjoint lane ranges, so one pooled matmul == concat(p1, p2).
        pooled = jnp.dot(pool, x1 + x2, preferred_element_type=f32)        # [Gp, 128]
        # Packed head: wl rows 0:H1 = wl1, rows H1:H1+H2 = wl2.
        logits = jnp.dot(pooled, wl_ref[...], preferred_element_type=f32) + bl_ref[...]
        col_ids = jax.lax.broadcasted_iota(jnp.int32, logits.shape, 1)
        logits = jnp.where(col_ids < n_classes, logits, -1e30)             # mask padded classes
        mx = jnp.max(logits, axis=-1, keepdims=True)
        lse = jnp.log(jnp.sum(jnp.exp(logits - mx), axis=-1, keepdims=True)) + mx
        out_ref[...] = logits - lse

    return kernel


def gect_forward(x, edge_index, edge_attr, batch, num_graphs, params):
    """Wrapper: lane-pad features/weights, pass index vectors, call the kernel."""
    N, F = x.shape
    E = edge_attr.shape[0]
    G = int(num_graphs)
    H1 = params["w1"].shape[1]
    H2 = params["w2"].shape[1]
    C = params["bl"].shape[1]

    Np = _ceil_to(N, 8)
    Ep = _ceil_to(E, 8)
    Gp = _ceil_to(max(G, 8), 8)

    # Index vectors.  Clip so an in-kernel one-hot can never select a padded row.
    src = jnp.pad(jnp.clip(edge_index[0].astype(jnp.int32), 0, N - 1), (0, Ep - E))
    dst = jnp.pad(jnp.clip(edge_index[1].astype(jnp.int32), 0, N - 1), (0, Ep - E))
    bat = jnp.pad(jnp.clip(batch.astype(jnp.int32), 0, G - 1), (0, Np - N))
    src_col = src.reshape(Ep, 1)     # broadcast against node-iota lanes
    dst_row = dst.reshape(1, Ep)     # broadcast against node-iota sublanes
    bat_row = bat.reshape(1, Np)
    eps = jnp.array([params["eps1"], params["eps2"]], jnp.float32)

    def pad2(a, rows, cols, row_off=0, col_off=0):
        a = a.astype(jnp.float32)
        return jnp.pad(a, ((row_off, rows - row_off - a.shape[0]),
                           (col_off, cols - col_off - a.shape[1])))

    xp = pad2(x, Np, LANE)                      # [Np, 128]
    eap = pad2(edge_attr, Ep, 1)                # [Ep, 1]

    we1 = pad2(params["we1"], 1, LANE); be1 = pad2(params["be1"], 1, LANE)
    w1 = pad2(params["w1"], LANE, LANE); b1 = pad2(params["b1"], 1, LANE)
    g1 = pad2(params["g1"], 1, LANE);   bt1 = pad2(params["bt1"], 1, LANE)
    we2 = pad2(params["we2"], 1, LANE); be2 = pad2(params["be2"], 1, LANE)
    # conv2 output is column-shifted to lanes [H1, H1+H2) so concat == lane union.
    w2 = pad2(params["w2"], LANE, LANE, col_off=H1)
    b2 = pad2(params["b2"], 1, LANE, col_off=H1)
    g2 = pad2(params["g2"], 1, LANE, col_off=H1)
    bt2 = pad2(params["bt2"], 1, LANE, col_off=H1)
    # Packed head weight: rows 0:H1 = wl1, rows H1:H1+H2 = wl2.
    wl = pad2(params["wl1"], LANE, LANE) + pad2(params["wl2"], LANE, LANE, row_off=H1)
    bl = pad2(params["bl"], 1, LANE)

    smem = pl.BlockSpec(memory_space=pltpu.MemorySpace.SMEM)
    vmem = pl.BlockSpec(memory_space=pltpu.MemorySpace.VMEM)

    ins = [eps, src_col, dst_row, bat_row, xp, eap,
           we1, be1, w1, b1, g1, bt1,
           we2, be2, w2, b2, g2, bt2,
           wl, bl]
    in_specs = [smem] + [vmem] * (len(ins) - 1)

    # VMEM budget sized from the actual working set (tile-rounded), + 4 MiB headroom,
    # capped at the v7x 64 MiB ceiling.  No artificial 32 MiB floor.
    est_bytes = 4 * (
        3 * _ceil_to(max(Np, Ep), 8) * LANE      # int32 index rows (tile-rounded)
        + (Np + Ep) * LANE                       # x, edge_attr (tile-rounded)
        + 3 * LANE * LANE + 12 * LANE            # w1, w2, wl + single-row params
        + Gp * LANE                              # output
        + 2 * Ep * Np + Gp * Np                  # in-kernel one-hot operators
        + 8 * max(Np, Ep, Gp) * LANE             # activation temporaries / spills
    )
    vmem_limit = int(min(64 * 2**20, est_bytes + 4 * 2**20))

    # TODO(synk): no grid / dimension_semantics yet -> single TensorCore on v7x;
    # the large-graph edge-tiled CSR path should add a "parallel" grid axis.
    out = pl.pallas_call(
        _make_kernel(N, E, C),
        out_shape=jax.ShapeDtypeStruct((Gp, LANE), jnp.float32),
        in_specs=in_specs,
        out_specs=vmem,
        compiler_params=pltpu.CompilerParams(vmem_limit_bytes=vmem_limit),
    )(*ins)
    return out[:G, :C]


def gect_reference(x, edge_index, edge_attr, batch, num_graphs, params):
    """Pure-JAX reference replicating the PyTorch forward (for validation)."""
    N = x.shape[0]
    src, dst = edge_index[0], edge_index[1]

    def conv(xin, we, be, w, b, g, bt, eps):
        e = edge_attr * we + be
        m = jax.nn.relu(xin[src] + e)
        agg = jnp.zeros((N, xin.shape[1]), jnp.float32).at[dst].add(m)
        h = (1.0 + eps) * xin + agg
        z = h @ w + b
        mean = z.mean(axis=0, keepdims=True)
        var = ((z - mean) ** 2).mean(axis=0, keepdims=True)
        zbn = (z - mean) / jnp.sqrt(var + BN_EPS) * g + bt
        return jnp.where(zbn >= 0, zbn, NEG_SLOPE * zbn)

    x1 = conv(x, params["we1"], params["be1"], params["w1"], params["b1"],
              params["g1"], params["bt1"], params["eps1"])
    x2 = conv(x1, params["we2"], params["be2"], params["w2"], params["b2"],
              params["g2"], params["bt2"], params["eps2"])
    p1 = jnp.zeros((num_graphs, x1.shape[1]), jnp.float32).at[batch].add(x1)
    p2 = jnp.zeros((num_graphs, x2.shape[1]), jnp.float32).at[batch].add(x2)
    logits = p1 @ params["wl1"] + p2 @ params["wl2"] + params["bl"]
    return jax.nn.log_softmax(logits, axis=-1)


def init_params(key, num_features, num_hidden, num_classes):
    F, H1, H2 = num_features, num_hidden[0], num_hidden[1]
    ks = jax.random.split(key, 10)
    sc = 0.2
    return {
        # GINEConv1: edge Linear(1, F), nn1 = Linear(F, H1) + BN(H1)
        "we1": sc * jax.random.normal(ks[0], (1, F), jnp.float32),
        "be1": sc * jax.random.normal(ks[1], (1, F), jnp.float32),
        "w1":  sc * jax.random.normal(ks[2], (F, H1), jnp.float32),
        "b1":  sc * jax.random.normal(ks[3], (1, H1), jnp.float32),
        "g1":  jnp.ones((1, H1), jnp.float32),
        "bt1": jnp.zeros((1, H1), jnp.float32),
        # GINEConv2: edge Linear(1, H1), nn2 = Linear(H1, H2) + BN(H2)
        "we2": sc * jax.random.normal(ks[4], (1, H1), jnp.float32),
        "be2": sc * jax.random.normal(ks[5], (1, H1), jnp.float32),
        "w2":  sc * jax.random.normal(ks[6], (H1, H2), jnp.float32),
        "b2":  sc * jax.random.normal(ks[7], (1, H2), jnp.float32),
        "g2":  jnp.ones((1, H2), jnp.float32),
        "bt2": jnp.zeros((1, H2), jnp.float32),
        # head: Linear(H1 + H2, C) split into the H1-block and H2-block
        "wl1": sc * jax.random.normal(ks[8], (H1, num_classes), jnp.float32),
        "wl2": sc * jax.random.normal(ks[9], (H2, num_classes), jnp.float32),
        "bl":  jnp.zeros((1, num_classes), jnp.float32),
        # learnable eps of GINEConv (train_eps=True), init 0
        "eps1": jnp.float32(0.0),
        "eps2": jnp.float32(0.0),
    }


if __name__ == "__main__":
    # Small deterministic graph batch: 2 graphs, 16 nodes, 32 edges.
    N, E, G = 16, 32, 2
    NUM_FEATURES = 5
    NUM_HIDDEN = [20, 2]
    NUM_CLASSES = 3

    key = jax.random.PRNGKey(0)
    kx, ks, kd, ke, kp = jax.random.split(key, 5)

    x = jax.random.normal(kx, (N, NUM_FEATURES), jnp.float32)
    src = jax.random.randint(ks, (E,), 0, N, dtype=jnp.int32)
    dst = jax.random.randint(kd, (E,), 0, N, dtype=jnp.int32)
    edge_index = jnp.stack([src, dst], axis=0)               # [2, E]
    edge_attr = jax.random.normal(ke, (E, 1), jnp.float32)   # [E, 1]
    batch = jnp.repeat(jnp.arange(G, dtype=jnp.int32), N // G)  # [N]

    params = init_params(kp, NUM_FEATURES, NUM_HIDDEN, NUM_CLASSES)

    out = gect_forward(x, edge_index, edge_attr, batch, G, params)
    out = jax.block_until_ready(out)

    ref = jax.block_until_ready(
        gect_reference(x, edge_index, edge_attr, batch, G, params))

    assert out.shape == (G, NUM_CLASSES)
    assert bool(jnp.all(jnp.isfinite(out)))
    assert bool(jnp.allclose(out, ref, atol=1e-4, rtol=1e-4)), (out, ref)

    print("KERNEL_OK")
</pallas_src>

<mosaic_0001>
module attributes {stable_mosaic.version = 11 : i64} {
  func.func @kernel(%arg0: memref<2xf32, #tpu.memory_space<smem>>, %arg1: memref<32x1xi32, #tpu.memory_space<vmem>>, %arg2: memref<1x32xi32, #tpu.memory_space<vmem>>, %arg3: memref<1x16xi32, #tpu.memory_space<vmem>>, %arg4: memref<16x128xf32, #tpu.memory_space<vmem>>, %arg5: memref<32x1xf32, #tpu.memory_space<vmem>>, %arg6: memref<1x128xf32, #tpu.memory_space<vmem>>, %arg7: memref<1x128xf32, #tpu.memory_space<vmem>>, %arg8: memref<128x128xf32, #tpu.memory_space<vmem>>, %arg9: memref<1x128xf32, #tpu.memory_space<vmem>>, %arg10: memref<1x128xf32, #tpu.memory_space<vmem>>, %arg11: memref<1x128xf32, #tpu.memory_space<vmem>>, %arg12: memref<1x128xf32, #tpu.memory_space<vmem>>, %arg13: memref<1x128xf32, #tpu.memory_space<vmem>>, %arg14: memref<128x128xf32, #tpu.memory_space<vmem>>, %arg15: memref<1x128xf32, #tpu.memory_space<vmem>>, %arg16: memref<1x128xf32, #tpu.memory_space<vmem>>, %arg17: memref<1x128xf32, #tpu.memory_space<vmem>>, %arg18: memref<128x128xf32, #tpu.memory_space<vmem>>, %arg19: memref<1x128xf32, #tpu.memory_space<vmem>>, %arg20: memref<8x128xf32, #tpu.memory_space<vmem>>) attributes {dimension_semantics = [], scalar_prefetch = 0 : i64, scratch_operands = 0 : i64, tpu.core_type = #tpu.core_type<tc>} {
    %0 = tpu.iota {dimensions = array<i32: 1>} : vector<32x16xi32>
    %c0 = arith.constant 0 : index
    %c0_0 = arith.constant 0 : index
    %1 = vector.load %arg1[%c0, %c0_0] : memref<32x1xi32, #tpu.memory_space<vmem>>, vector<32x1xi32>
    %2 = vector.broadcast %1 : vector<32x1xi32> to vector<32x16xi32>
    %3 = arith.cmpi eq, %0, %2 : vector<32x16xi32>
    %4 = arith.extui %3 : vector<32x16xi1> to vector<32x16xi32>
    %5 = arith.sitofp %4 : vector<32x16xi32> to vector<32x16xf32>
    %6 = tpu.iota {dimensions = array<i32: 0>} : vector<16x32xi32>
    %c0_1 = arith.constant 0 : index
    %c0_2 = arith.constant 0 : index
    %7 = vector.load %arg2[%c0_1, %c0_2] : memref<1x32xi32, #tpu.memory_space<vmem>>, vector<1x32xi32>
    %8 = vector.broadcast %7 : vector<1x32xi32> to vector<16x32xi32>
    %9 = arith.cmpi eq, %6, %8 : vector<16x32xi32>
    %10 = tpu.iota {dimensions = array<i32: 1>} : vector<16x32xi32>
    %c32_i32 = arith.constant 32 : i32
    %11 = vector.broadcast %c32_i32 : i32 to vector<16x32xi32>
    %12 = arith.cmpi slt, %10, %11 : vector<16x32xi32>
    %13 = arith.andi %9, %12 : vector<16x32xi1>
    %14 = arith.extui %13 : vector<16x32xi1> to vector<16x32xi32>
    %15 = arith.sitofp %14 : vector<16x32xi32> to vector<16x32xf32>
    %16 = tpu.iota {dimensions = array<i32: 0>} : vector<8x16xi32>
    %c0_3 = arith.constant 0 : index
    %c0_4 = arith.constant 0 : index
    %17 = vector.load %arg3[%c0_3, %c0_4] : memref<1x16xi32, #tpu.memory_space<vmem>>, vector<1x16xi32>
    %18 = vector.broadcast %17 : vector<1x16xi32> to vector<8x16xi32>
    %19 = arith.cmpi eq, %16, %18 : vector<8x16xi32>
    %20 = tpu.iota {dimensions = array<i32: 1>} : vector<8x16xi32>
    %c16_i32 = arith.constant 16 : i32
    %21 = vector.broadcast %c16_i32 : i32 to vector<8x16xi32>
    %22 = arith.cmpi slt, %20, %21 : vector<8x16xi32>
    %23 = arith.andi %19, %22 : vector<8x16xi1>
    %24 = arith.extui %23 : vector<8x16xi1> to vector<8x16xi32>
    %25 = arith.sitofp %24 : vector<8x16xi32> to vector<8x16xf32>
    %c0_5 = arith.constant 0 : index
    %c0_6 = arith.constant 0 : index
    %26 = vector.load %arg5[%c0_5, %c0_6] : memref<32x1xf32, #tpu.memory_space<vmem>>, vector<32x1xf32>
    %27 = tpu.iota {dimensions = array<i32: 0>} : vector<16x1xi32>
    %c16_i32_7 = arith.constant 16 : i32
    %28 = vector.broadcast %c16_i32_7 : i32 to vector<16x1xi32>
    %29 = arith.cmpi slt, %27, %28 : vector<16x1xi32>
    %30 = arith.extui %29 : vector<16x1xi1> to vector<16x1xi32>
    %31 = arith.sitofp %30 : vector<16x1xi32> to vector<16x1xf32>
    %c0_8 = arith.constant 0 : index
    %c0_9 = arith.constant 0 : index
    %32 = vector.load %arg4[%c0_8, %c0_9] : memref<16x128xf32, #tpu.memory_space<vmem>>, vector<16x128xf32>
    %c0_10 = arith.constant 0 : index
    %c0_11 = arith.constant 0 : index
    %33 = vector.load %arg6[%c0_10, %c0_11] : memref<1x128xf32, #tpu.memory_space<vmem>>, vector<1x128xf32>
    %c0_12 = arith.constant 0 : index
    %c0_13 = arith.constant 0 : index
    %34 = vector.load %arg7[%c0_12, %c0_13] : memref<1x128xf32, #tpu.memory_space<vmem>>, vector<1x128xf32>
    %c0_14 = arith.constant 0 : index
    %c0_15 = arith.constant 0 : index
    %35 = vector.load %arg8[%c0_14, %c0_15] : memref<128x128xf32, #tpu.memory_space<vmem>>, vector<128x128xf32>
    %c0_16 = arith.constant 0 : index
    %c0_17 = arith.constant 0 : index
    %36 = vector.load %arg9[%c0_16, %c0_17] : memref<1x128xf32, #tpu.memory_space<vmem>>, vector<1x128xf32>
    %c0_18 = arith.constant 0 : index
    %c0_19 = arith.constant 0 : index
    %37 = vector.load %arg10[%c0_18, %c0_19] : memref<1x128xf32, #tpu.memory_space<vmem>>, vector<1x128xf32>
    %c0_20 = arith.constant 0 : index
    %c0_21 = arith.constant 0 : index
    %38 = vector.load %arg11[%c0_20, %c0_21] : memref<1x128xf32, #tpu.memory_space<vmem>>, vector<1x128xf32>
    %c0_22 = arith.constant 0 : index
    %39 = memref.load %arg0[%c0_22] : memref<2xf32, #tpu.memory_space<smem>>
    %40 = vector.broadcast %26 : vector<32x1xf32> to vector<32x128xf32>
    %41 = vector.broadcast %33 : vector<1x128xf32> to vector<32x128xf32>
    %42 = arith.mulf %40, %41 : vector<32x128xf32>
    %43 = vector.broadcast %34 : vector<1x128xf32> to vector<32x128xf32>
    %44 = arith.addf %42, %43 : vector<32x128xf32>
    %cst = arith.constant dense<0.000000e+00> : vector<32x128xf32>
    %45 = tpu.matmul %5, %32, %cst {dimension_numbers = #tpu.dot_dimension_numbers<[1], [0], [0], [1], [0, 0, 1, 1], [], []>} : vector<32x16xf32>, vector<16x128xf32>, vector<32x128xf32> -> vector<32x128xf32>
    %46 = arith.addf %45, %44 : vector<32x128xf32>
    %cst_23 = arith.constant 0.000000e+00 : f32
    %47 = vector.broadcast %cst_23 : f32 to vector<32x128xf32>
    %48 = arith.maximumf %46, %47 : vector<32x128xf32>
    %cst_24 = arith.constant dense<0.000000e+00> : vector<16x128xf32>
    %49 = tpu.matmul %15, %48, %cst_24 {dimension_numbers = #tpu.dot_dimension_numbers<[1], [0], [0], [1], [0, 0, 1, 1], [], []>} : vector<16x32xf32>, vector<32x128xf32>, vector<16x128xf32> -> vector<16x128xf32>
    %cst_25 = arith.constant 1.000000e+00 : f32
    %50 = arith.addf %cst_25, %39 : f32
    %51 = vector.broadcast %50 : f32 to vector<16x128xf32>
    %52 = arith.mulf %51, %32 : vector<16x128xf32>
    %53 = arith.addf %52, %49 : vector<16x128xf32>
    %cst_26 = arith.constant dense<0.000000e+00> : vector<16x128xf32>
    %54 = tpu.matmul %53, %35, %cst_26 {dimension_numbers = #tpu.dot_dimension_numbers<[1], [0], [0], [1], [0, 0, 1, 1], [], []>} : vector<16x128xf32>, vector<128x128xf32>, vector<16x128xf32> -> vector<16x128xf32>
    %55 = vector.broadcast %36 : vector<1x128xf32> to vector<16x128xf32>
    %56 = arith.addf %54, %55 : vector<16x128xf32>
    %57 = vector.broadcast %31 : vector<16x1xf32> to vector<16x128xf32>
    %58 = arith.mulf %56, %57 : vector<16x128xf32>
    %cst_27 = arith.constant dense<0.000000e+00> : vector<128xf32>
    %59 = vector.multi_reduction <add>, %58, %cst_27 [0] : vector<16x128xf32> to vector<128xf32>
    %60 = vector.shape_cast %59 : vector<128xf32> to vector<1x128xf32>
    %cst_28 = arith.constant 6.250000e-02 : f32
    %61 = vector.broadcast %cst_28 : f32 to vector<1x128xf32>
    %62 = arith.mulf %60, %61 : vector<1x128xf32>
    %63 = vector.broadcast %62 : vector<1x128xf32> to vector<16x128xf32>
    %64 = arith.subf %56, %63 : vector<16x128xf32>
    %65 = vector.broadcast %31 : vector<16x1xf32> to vector<16x128xf32>
    %66 = arith.mulf %64, %65 : vector<16x128xf32>
    %67 = arith.mulf %66, %66 : vector<16x128xf32>
    %cst_29 = arith.constant dense<0.000000e+00> : vector<128xf32>
    %68 = vector.multi_reduction <add>, %67, %cst_29 [0] : vector<16x128xf32> to vector<128xf32>
    %69 = vector.shape_cast %68 : vector<128xf32> to vector<1x128xf32>
    %cst_30 = arith.constant 6.250000e-02 : f32
    %70 = vector.broadcast %cst_30 : f32 to vector<1x128xf32>
    %71 = arith.mulf %69, %70 : vector<1x128xf32>
    %72 = vector.broadcast %62 : vector<1x128xf32> to vector<16x128xf32>
    %73 = arith.subf %56, %72 : vector<16x128xf32>
    %cst_31 = arith.constant 9.99999974E-6 : f32
    %74 = vector.broadcast %cst_31 : f32 to vector<1x128xf32>
    %75 = arith.addf %71, %74 : vector<1x128xf32>
    %76 = math.rsqrt %75 : vector<1x128xf32>
    %77 = vector.broadcast %76 : vector<1x128xf32> to vector<16x128xf32>
    %78 = arith.mulf %73, %77 : vector<16x128xf32>
    %79 = vector.broadcast %37 : vector<1x128xf32> to vector<16x128xf32>
    %80 = arith.mulf %78, %79 : vector<16x128xf32>
    %81 = vector.broadcast %38 : vector<1x128xf32> to vector<16x128xf32>
    %82 = arith.addf %80, %81 : vector<16x128xf32>
    %cst_32 = arith.constant 0.000000e+00 : f32
    %83 = vector.broadcast %cst_32 : f32 to vector<16x128xf32>
    %84 = arith.cmpf oge, %82, %83 : vector<16x128xf32>
    %cst_33 = arith.constant 0.00999999977 : f32
    %85 = vector.broadcast %cst_33 : f32 to vector<16x128xf32>
    %86 = arith.mulf %85, %82 : vector<16x128xf32>
    %87 = arith.select %84, %82, %86 : vector<16x128xi1>, vector<16x128xf32>
    %c0_34 = arith.constant 0 : index
    %c0_35 = arith.constant 0 : index
    %88 = vector.load %arg12[%c0_34, %c0_35] : memref<1x128xf32, #tpu.memory_space<vmem>>, vector<1x128xf32>
    %c0_36 = arith.constant 0 : index
    %c0_37 = arith.constant 0 : index
    %89 = vector.load %arg13[%c0_36, %c0_37] : memref<1x128xf32, #tpu.memory_space<vmem>>, vector<1x128xf32>
    %c0_38 = arith.constant 0 : index
    %c0_39 = arith.constant 0 : index
    %90 = vector.load %arg14[%c0_38, %c0_39] : memref<128x128xf32, #tpu.memory_space<vmem>>, vector<128x128xf32>
    %c0_40 = arith.constant 0 : index
    %c0_41 = arith.constant 0 : index
    %91 = vector.load %arg15[%c0_40, %c0_41] : memref<1x128xf32, #tpu.memory_space<vmem>>, vector<1x128xf32>
    %c0_42 = arith.constant 0 : index
    %c0_43 = arith.constant 0 : index
    %92 = vector.load %arg16[%c0_42, %c0_43] : memref<1x128xf32, #tpu.memory_space<vmem>>, vector<1x128xf32>
    %c0_44 = arith.constant 0 : index
    %c0_45 = arith.constant 0 : index
    %93 = vector.load %arg17[%c0_44, %c0_45] : memref<1x128xf32, #tpu.memory_space<vmem>>, vector<1x128xf32>
    %c1 = arith.constant 1 : index
    %94 = memref.load %arg0[%c1] : memref<2xf32, #tpu.memory_space<smem>>
    %95 = vector.broadcast %26 : vector<32x1xf32> to vector<32x128xf32>
    %96 = vector.broadcast %88 : vector<1x128xf32> to vector<32x128xf32>
    %97 = arith.mulf %95, %96 : vector<32x128xf32>
    %98 = vector.broadcast %89 : vector<1x128xf32> to vector<32x128xf32>
    %99 = arith.addf %97, %98 : vector<32x128xf32>
    %cst_46 = arith.constant dense<0.000000e+00> : vector<32x128xf32>
    %100 = tpu.matmul %5, %87, %cst_46 {dimension_numbers = #tpu.dot_dimension_numbers<[1], [0], [0], [1], [0, 0, 1, 1], [], []>} : vector<32x16xf32>, vector<16x128xf32>, vector<32x128xf32> -> vector<32x128xf32>
    %101 = arith.addf %100, %99 : vector<32x128xf32>
    %cst_47 = arith.constant 0.000000e+00 : f32
    %102 = vector.broadcast %cst_47 : f32 to vector<32x128xf32>
    %103 = arith.maximumf %101, %102 : vector<32x128xf32>
    %cst_48 = arith.constant dense<0.000000e+00> : vector<16x128xf32>
    %104 = tpu.matmul %15, %103, %cst_48 {dimension_numbers = #tpu.dot_dimension_numbers<[1], [0], [0], [1], [0, 0, 1, 1], [], []>} : vector<16x32xf32>, vector<32x128xf32>, vector<16x128xf32> -> vector<16x128xf32>
    %cst_49 = arith.constant 1.000000e+00 : f32
    %105 = arith.addf %cst_49, %94 : f32
    %106 = vector.broadcast %105 : f32 to vector<16x128xf32>
    %107 = arith.mulf %106, %87 : vector<16x128xf32>
    %108 = arith.addf %107, %104 : vector<16x128xf32>
    %cst_50 = arith.constant dense<0.000000e+00> : vector<16x128xf32>
    %109 = tpu.matmul %108, %90, %cst_50 {dimension_numbers = #tpu.dot_dimension_numbers<[1], [0], [0], [1], [0, 0, 1, 1], [], []>} : vector<16x128xf32>, vector<128x128xf32>, vector<16x128xf32> -> vector<16x128xf32>
    %110 = vector.broadcast %91 : vector<1x128xf32> to vector<16x128xf32>
    %111 = arith.addf %109, %110 : vector<16x128xf32>
    %112 = vector.broadcast %31 : vector<16x1xf32> to vector<16x128xf32>
    %113 = arith.mulf %111, %112 : vector<16x128xf32>
    %cst_51 = arith.constant dense<0.000000e+00> : vector<128xf32>
    %114 = vector.multi_reduction <add>, %113, %cst_51 [0] : vector<16x128xf32> to vector<128xf32>
    %115 = vector.shape_cast %114 : vector<128xf32> to vector<1x128xf32>
    %cst_52 = arith.constant 6.250000e-02 : f32
    %116 = vector.broadcast %cst_52 : f32 to vector<1x128xf32>
    %117 = arith.mulf %115, %116 : vector<1x128xf32>
    %118 = vector.broadcast %117 : vector<1x128xf32> to vector<16x128xf32>
    %119 = arith.subf %111, %118 : vector<16x128xf32>
    %120 = vector.broadcast %31 : vector<16x1xf32> to vector<16x128xf32>
    %121 = arith.mulf %119, %120 : vector<16x128xf32>
    %122 = arith.mulf %121, %121 : vector<16x128xf32>
    %cst_53 = arith.constant dense<0.000000e+00> : vector<128xf32>
    %123 = vector.multi_reduction <add>, %122, %cst_53 [0] : vector<16x128xf32> to vector<128xf32>
    %124 = vector.shape_cast %123 : vector<128xf32> to vector<1x128xf32>
    %cst_54 = arith.constant 6.250000e-02 : f32
    %125 = vector.broadcast %cst_54 : f32 to vector<1x128xf32>
    %126 = arith.mulf %124, %125 : vector<1x128xf32>
    %127 = vector.broadcast %117 : vector<1x128xf32> to vector<16x128xf32>
    %128 = arith.subf %111, %127 : vector<16x128xf32>
    %cst_55 = arith.constant 9.99999974E-6 : f32
    %129 = vector.broadcast %cst_55 : f32 to vector<1x128xf32>
    %130 = arith.addf %126, %129 : vector<1x128xf32>
    %131 = math.rsqrt %130 : vector<1x128xf32>
    %132 = vector.broadcast %131 : vector<1x128xf32> to vector<16x128xf32>
    %133 = arith.mulf %128, %132 : vector<16x128xf32>
    %134 = vector.broadcast %92 : vector<1x128xf32> to vector<16x128xf32>
    %135 = arith.mulf %133, %134 : vector<16x128xf32>
    %136 = vector.broadcast %93 : vector<1x128xf32> to vector<16x128xf32>
    %137 = arith.addf %135, %136 : vector<16x128xf32>
    %cst_56 = arith.constant 0.000000e+00 : f32
    %138 = vector.broadcast %cst_56 : f32 to vector<16x128xf32>
    %139 = arith.cmpf oge, %137, %138 : vector<16x128xf32>
    %cst_57 = arith.constant 0.00999999977 : f32
    %140 = vector.broadcast %cst_57 : f32 to vector<16x128xf32>
    %141 = arith.mulf %140, %137 : vector<16x128xf32>
    %142 = arith.select %139, %137, %141 : vector<16x128xi1>, vector<16x128xf32>
    %143 = arith.addf %87, %142 : vector<16x128xf32>
    %cst_58 = arith.constant dense<0.000000e+00> : vector<8x128xf32>
    %144 = tpu.matmul %25, %143, %cst_58 {dimension_numbers = #tpu.dot_dimension_numbers<[1], [0], [0], [1], [0, 0, 1, 1], [], []>} : vector<8x16xf32>, vector<16x128xf32>, vector<8x128xf32> -> vector<8x128xf32>
    %c0_59 = arith.constant 0 : index
    %c0_60 = arith.constant 0 : index
    %145 = vector.load %arg18[%c0_59, %c0_60] : memref<128x128xf32, #tpu.memory_space<vmem>>, vector<128x128xf32>
    %cst_61 = arith.constant dense<0.000000e+00> : vector<8x128xf32>
    %146 = tpu.matmul %144, %145, %cst_61 {dimension_numbers = #tpu.dot_dimension_numbers<[1], [0], [0], [1], [0, 0, 1, 1], [], []>} : vector<8x128xf32>, vector<128x128xf32>, vector<8x128xf32> -> vector<8x128xf32>
    %c0_62 = arith.constant 0 : index
    %c0_63 = arith.constant 0 : index
    %147 = vector.load %arg19[%c0_62, %c0_63] : memref<1x128xf32, #tpu.memory_space<vmem>>, vector<1x128xf32>
    %148 = vector.broadcast %147 : vector<1x128xf32> to vector<8x128xf32>
    %149 = arith.addf %146, %148 : vector<8x128xf32>
    %150 = tpu.iota {dimensions = array<i32: 1>} : vector<8x128xi32>
    %c3_i32 = arith.constant 3 : i32
    %151 = vector.broadcast %c3_i32 : i32 to vector<8x128xi32>
    %152 = arith.cmpi slt, %150, %151 : vector<8x128xi32>
    %cst_64 = arith.constant -1.000000e+30 : f32
    %153 = vector.broadcast %cst_64 : f32 to vector<8x128xf32>
    %154 = arith.select %152, %149, %153 : vector<8x128xi1>, vector<8x128xf32>
    %cst_65 = arith.constant dense<0xFF800000> : vector<8xf32>
    %155 = vector.multi_reduction <maximumf>, %154, %cst_65 [1] : vector<8x128xf32> to vector<8xf32>
    %156 = vector.shape_cast %155 : vector<8xf32> to vector<8x1xf32>
    %157 = vector.broadcast %156 : vector<8x1xf32> to vector<8x128xf32>
    %158 = arith.subf %154, %157 : vector<8x128xf32>
    %159 = math.exp %158 : vector<8x128xf32>
    %cst_66 = arith.constant dense<0.000000e+00> : vector<8xf32>
    %160 = vector.multi_reduction <add>, %159, %cst_66 [1] : vector<8x128xf32> to vector<8xf32>
    %161 = vector.shape_cast %160 : vector<8xf32> to vector<8x1xf32>
    %162 = math.log %161 : vector<8x1xf32>
    %163 = arith.addf %162, %156 : vector<8x1xf32>
    %164 = vector.broadcast %163 : vector<8x1xf32> to vector<8x128xf32>
    %165 = arith.subf %154, %164 : vector<8x128xf32>
    %c0_67 = arith.constant 0 : index
    %c0_68 = arith.constant 0 : index
    %166 = vector.load %arg20[%c0_67, %c0_68] : memref<8x128xf32, #tpu.memory_space<vmem>>, vector<8x128xf32>
    tpu.vector_store %arg20[%c0_67, %c0_68], %165 {strides = array<i32>} : memref<8x128xf32, #tpu.memory_space<vmem>>, vector<8x128xf32>,
    return
  }
}

</mosaic_0001>

<bundles_post_ra>
// kernel: tpu_custom_call.1
= control target key start
LH: loop header
LB: loop body
LE: loop exit
PB: predicated region body
PF: predicated region fallthrough
CT: control target
= control target key end

     0   :  { %s2345_s0 = inlined_call_operand.vmem [shape: f32[2], index: 0, kind: input, shape index: {}]   ;;  %s2346_s1 = inlined_call_operand.vmem [shape: s32[32,1], index: 1, kind: input, shape index: {}]   ;;  %s2347_s2 = inlined_call_operand.vmem [shape: s32[1,32], index: 2, kind: input, shape index: {}]   ;;  %s2348_s3 = inlined_call_operand.vmem [shape: s32[1,16], index: 3, kind: input, shape index: {}]   ;;  %s2349_s4 = inlined_call_operand.hbm [shape: f32[16,128], index: 4, kind: input, shape index: {}]   ;;  %s2350_s5 = inlined_call_operand.vmem [shape: f32[32,1], index: 5, kind: input, shape index: {}]   ;;  %s2351_s6 = inlined_call_operand.vmem [shape: f32[1,128], index: 6, kind: input, shape index: {}]   ;;  %s2352_s7 = inlined_call_operand.vmem [shape: f32[1,128], index: 7, kind: input, shape index: {}]   ;;  %s2353_s8 = inlined_call_operand.hbm [shape: f32[128,128], index: 8, kind: input, shape index: {}]   ;;  %s2354_s9 = inlined_call_operand.vmem [shape: f32[1,128], index: 9, kind: input, shape index: {}]   ;;  %s2355_s10 = inlined_call_operand.hbm [shape: f32[1,128], index: 10, kind: input, shape index: {}]   ;;  %s2356_s11 = inlined_call_operand.hbm [shape: f32[1,128], index: 11, kind: input, shape index: {}]   ;;  %s2357_s12 = inlined_call_operand.hbm [shape: f32[1,128], index: 12, kind: input, shape index: {}]   ;;  %s2358_s13 = inlined_call_operand.hbm [shape: f32[1,128], index: 13, kind: input, shape index: {}]   ;;  %s2359_s14 = inlined_call_operand.hbm [shape: f32[128,128], index: 14, kind: input, shape index: {}]   ;;  %s2360_s15 = inlined_call_operand.hbm [shape: f32[1,128], index: 15, kind: input, shape index: {}]   ;;  %s2361_s16 = inlined_call_operand.hbm [shape: f32[1,128], index: 16, kind: input, shape index: {}]   ;;  %s2362_s17 = inlined_call_operand.hbm [shape: f32[1,128], index: 17, kind: input, shape index: {}]   ;;  %s2363_s18 = inlined_call_operand.vmem [shape: f32[128,128], index: 18, kind: input, shape index: {}]   ;;  %s2364_s19 = inlined_call_operand.vmem [shape: f32[1,128], index: 19, kind: input, shape index: {}]   ;;  %s2365_s20 = inlined_call_operand.hbm [shape: f32[8,128], index: 20, kind: output, shape index: {}]  }
   0x1   :  { %2368 = sst [smem:[#allocation30_spill]] %s2345_s0 }
   0x2   :  { %2369 = sst [smem:[#allocation31_spill]] %s2346_s1 }
   0x3   :  { %2370 = sst [smem:[#allocation32_spill]] %s2347_s2 }
   0x4   :  { %2371 = sst [smem:[#allocation33_spill]] %s2348_s3 }
   0x5   :  { %2372 = sst [smem:[#allocation34_spill]] %s2349_s4 }
   0x6   :  { %25 = vsyncpa [#allocation5], 0 }
   0x7   :  { %26 = vsyncpa [#allocation3], 0 }
   0x8   :  { %27 = vsyncpa [#allocation8], 0 }
   0x9   :  { %28 = vsyncpa [#allocation11], 0 }
   0xa   :  { %29 = vsyncpa [#allocation14], 0 }
   0xb   :  { %30 = vsyncpa [#allocation17], 0 }
   0xc   :  { %31 = vsyncpa [#allocation20], 0 }
   0xd   :  { %32 = vsyncpa [#allocation4], 0  ;;  %s1880_s1 = smov [#allocation7]   ;;  %s1881_s23 = smov [#allocation10]  }
   0xe   :  { %s72_s22 = sshll.u32 %s1880_s1, 4  ;;  %s97_s24 = sshll.u32 %s1881_s23, 4  ;;  %s73_s22 = int_to_ptr.vmem [resolvable:$true] %s72_s22  ;;  %s2003_s24 = int_to_ptr.vmem [resolvable:$true] %s97_s24 }
   0xf   :  { %s1610_s3 = scalar_lea.hbm %s2353_s8, 2048 }
  0x10   :  { %p1611_p0 = scmp.ne.s32.totalorder %s2353_s8, %s1610_s3  ;;  %p1614_p1 = scmp.lt.u32.totalorder %s1610_s3, %s2353_s8 }
  0x12   :  { %p1616_p2 = pnand %p1614_p1, %p1611_p0 }
  0x14   :  { %1619 = shalt.err (!%p1616_p2)
}
  0x15   :  { %s1620_s29 = scalar_lea.vmem %s73_s22, 2048  ;;  %p1625_p4 = scmp.lt.s32.totalorder %s73_s22, %s73_s22 }
  0x16   :  { %p1621_p3 = scmp.ne.s32.totalorder %s73_s22, %s1620_s29  ;;  %p1626_p5 = scmp.lt.s32.totalorder %s1620_s29, %s1620_s29 }
  0x18   :  { %p1627_p6 = por %p1626_p5, %p1625_p4 }
  0x1a   :  { %p1628_p7 = pnand %p1627_p6, %p1621_p3 }
  0x1c   :  { %1631 = shalt.err (!%p1628_p7)
}
  0x1d   :  { %s1882_s30 = smov 128   ;;  %s1883_s0 = smov 8  }
  0x1e   :  { %78 = dma.hbm_to_vmem [thread:$0]  %s2353_s8, 2048, %s73_s22, [#allocation8], %s1882_s30, %s1882_s30, %s1883_s0  }
  0x1f   :  { %s1632_s25 = scalar_lea.hbm %s2356_s11, 16 }
  0x20   :  { %p1633_p8 = scmp.ne.s32.totalorder %s2356_s11, %s1632_s25  ;;  %p1636_p9 = scmp.lt.u32.totalorder %s1632_s25, %s2356_s11 }
  0x22   :  { %p1638_p10 = pnand %p1636_p9, %p1633_p8 }
  0x24   :  { %1641 = shalt.err (!%p1638_p10)
}
  0x25   :  { %s1642_s4 = scalar_lea.vmem %s2003_s24, 16  ;;  %s1646_s8 = scalar_lea.vmem %s2003_s24, 32 }
  0x26   :  { %p1643_p11 = scmp.ne.s32.totalorder %s2003_s24, %s1642_s4  ;;  %p1647_p12 = scmp.lt.s32.totalorder %s2003_s24, %s2003_s24 }
  0x27   :  { %p1648_p13 = scmp.lt.s32.totalorder %s1646_s8, %s1642_s4 }
  0x29   :  { %p1649_p0 = por %p1648_p13, %p1647_p12 }
  0x2b   :  { %p1650_p1 = pnand %p1649_p0, %p1643_p11 }
  0x2d   :  { %1653 = shalt.err (!%p1650_p1)
}
  0x2e   :  { %100 = dma.hbm_to_vmem [thread:$0]  %s2356_s11, 16, %s2003_s24, [#allocation11]  }
  0x2f   :  { %s1884_s21 = smov [#allocation13]   ;;  %s1885_s23 = smov [#allocation16]  }
  0x30   :  { %s117_s1 = sshll.u32 %s1884_s21, 4  ;;  %s139_s2 = sshll.u32 %s1885_s23, 4  ;;  %s118_s1 = int_to_ptr.vmem [resolvable:$true] %s117_s1  ;;  %s140_s2 = int_to_ptr.vmem [resolvable:$true] %s139_s2 }
  0x31   :  { %s1654_s26 = scalar_lea.hbm %s2358_s13, 16 }
  0x32   :  { %p1655_p2 = scmp.ne.s32.totalorder %s2358_s13, %s1654_s26  ;;  %p1658_p3 = scmp.lt.u32.totalorder %s1654_s26, %s2358_s13 }
  0x34   :  { %p1660_p4 = pnand %p1658_p3, %p1655_p2 }
  0x36   :  { %1663 = shalt.err (!%p1660_p4)
}
  0x37   :  { %s1664_s11 = scalar_lea.vmem %s118_s1, 16  ;;  %s1668_s24 = scalar_lea.vmem %s118_s1, 32 }
  0x38   :  { %p1665_p5 = scmp.ne.s32.totalorder %s118_s1, %s1664_s11  ;;  %p1669_p6 = scmp.lt.s32.totalorder %s118_s1, %s118_s1 }
  0x39   :  { %p1670_p7 = scmp.lt.s32.totalorder %s1668_s24, %s1664_s11 }
  0x3b   :  { %p1671_p8 = por %p1670_p7, %p1669_p6 }
  0x3d   :  { %p1672_p9 = pnand %p1671_p8, %p1665_p5 }
  0x3f   :  { %1675 = shalt.err (!%p1672_p9)
}
  0x40   :  { %120 = dma.hbm_to_vmem [thread:$0]  %s2358_s13, 16, %s118_s1, [#allocation14]  }
  0x41   :  { %s1676_s25 = scalar_lea.hbm %s2360_s15, 16 }
  0x42   :  { %p1677_p10 = scmp.ne.s32.totalorder %s2360_s15, %s1676_s25  ;;  %p1680_p11 = scmp.lt.u32.totalorder %s1676_s25, %s2360_s15 }
  0x44   :  { %p1682_p12 = pnand %p1680_p11, %p1677_p10 }
  0x46   :  { %1685 = shalt.err (!%p1682_p12)
}
  0x47   :  { %s1686_s4 = scalar_lea.vmem %s140_s2, 16  ;;  %s1690_s8 = scalar_lea.vmem %s140_s2, 32 }
  0x48   :  { %p1687_p13 = scmp.ne.s32.totalorder %s140_s2, %s1686_s4  ;;  %p1691_p0 = scmp.lt.s32.totalorder %s140_s2, %s140_s2 }
  0x49   :  { %p1692_p1 = scmp.lt.s32.totalorder %s1690_s8, %s1686_s4 }
  0x4b   :  { %p1693_p2 = por %p1692_p1, %p1691_p0 }
  0x4d   :  { %p1694_p3 = pnand %p1693_p2, %p1687_p13 }
  0x4f   :  { %1697 = shalt.err (!%p1694_p3)
}
  0x50   :  { %142 = dma.hbm_to_vmem [thread:$0]  %s2360_s15, 16, %s140_s2, [#allocation17]  }
  0x51   :  { %s2373_s22 = sld [smem:[#allocation30_spill]] }
  0x57   :  { %s39_s29 = sshll.u32 %s2373_s22, 4  ;;  %s40_s29 = int_to_ptr.vmem [resolvable:$true] %s39_s29 }
  0x58   :  { %s1698_s21 = scalar_lea.vmem %s40_s29, 16  ;;  %p1703_p5 = scmp.lt.s32.totalorder %s40_s29, %s40_s29 }
  0x59   :  { %p1699_p4 = scmp.ne.s32.totalorder %s40_s29, %s1698_s21  ;;  %p1704_p6 = scmp.lt.s32.totalorder %s1698_s21, %s1698_s21 }
  0x5b   :  { %p1705_p7 = por %p1704_p6, %p1703_p5 }
  0x5d   :  { %p1706_p8 = pnand %p1705_p7, %p1699_p4 }
  0x5f   :  { %1709 = shalt.err (!%p1706_p8)
}
  0x60   :  { %s1886_s23 = smov [#allocation2]   ;;  %s1887_s25 = smov [#allocation6]  }
  0x61   :  { %42 = dma.vmem_to_smem %s40_s29, 16, %s1886_s23, [#allocation5]  }
  0x62   :  { %s54_s3 = sshll.u32 %s1887_s25, 4  ;;  %s1888_s26 = smov [#allocation9]   ;;  %s55_s3 = int_to_ptr.vmem [resolvable:$true] %s54_s3 }
  0x63   :  { %s87_s27 = sshll.u32 %s1888_s26, 4  ;;  %s2374_s28 = sld [smem:[#allocation34_spill]]  ;;  %s88_s27 = int_to_ptr.vmem [resolvable:$true] %s87_s27 }
  0x69   :  { %s1710_s4 = scalar_lea.hbm %s2374_s28, 256 }
  0x6a   :  { %p1711_p9 = scmp.ne.s32.totalorder %s2374_s28, %s1710_s4  ;;  %p1714_p10 = scmp.lt.u32.totalorder %s1710_s4, %s2374_s28 }
  0x6c   :  { %p1716_p11 = pnand %p1714_p10, %p1711_p9 }
  0x6e   :  { %1719 = shalt.err (!%p1716_p11)
}
  0x6f   :  { %s1720_s24 = scalar_lea.vmem %s55_s3, 256  ;;  %p1725_p13 = scmp.lt.s32.totalorder %s55_s3, %s55_s3 }
  0x70   :  { %p1721_p12 = scmp.ne.s32.totalorder %s55_s3, %s1720_s24  ;;  %p1726_p0 = scmp.lt.s32.totalorder %s1720_s24, %s1720_s24 }
  0x72   :  { %p1727_p1 = por %p1726_p0, %p1725_p13 }
  0x74   :  { %p1728_p2 = pnand %p1727_p1, %p1721_p12 }
  0x76   :  { %1731 = shalt.err (!%p1728_p2)
}
  0x77   :  { %60 = dma.hbm_to_vmem [thread:$0]  %s2374_s28, 256, %s55_s3, [#allocation3], %s1882_s30, %s1882_s30, %s1883_s0  }
  0x78   :  { %s1732_s25 = scalar_lea.hbm %s2355_s10, 16 }
  0x79   :  { %p1733_p3 = scmp.ne.s32.totalorder %s2355_s10, %s1732_s25  ;;  %p1736_p4 = scmp.lt.u32.totalorder %s1732_s25, %s2355_s10 }
  0x7b   :  { %p1738_p5 = pnand %p1736_p4, %p1733_p3 }
  0x7d   :  { %1741 = shalt.err (!%p1738_p5)
}
  0x7e   :  { %s1742_s8 = scalar_lea.vmem %s88_s27, 16  ;;  %s1746_s13 = scalar_lea.vmem %s88_s27, 32 }
  0x7f   :  { %p1743_p6 = scmp.ne.s32.totalorder %s88_s27, %s1742_s8  ;;  %p1747_p7 = scmp.lt.s32.totalorder %s88_s27, %s88_s27 }
  0x80   :  { %p1748_p8 = scmp.lt.s32.totalorder %s1746_s13, %s1742_s8 }
  0x82   :  { %p1749_p9 = por %p1748_p8, %p1747_p7 }
  0x84   :  { %p1750_p10 = pnand %p1749_p9, %p1743_p6 }
  0x86   :  { %1753 = shalt.err (!%p1750_p10)
}
  0x87   :  { %90 = dma.hbm_to_vmem [thread:$0]  %s2355_s10, 16, %s88_s27, [#allocation8]  }
  0x88   :  { %s1889_s1 = smov [#allocation12]   ;;  %s1890_s24 = smov [#allocation15]  }
  0x89   :  { %s107_s11 = sshll.u32 %s1889_s1, 4  ;;  %s126_s22 = sshll.u32 %s1890_s24, 4  ;;  %s108_s11 = int_to_ptr.vmem [resolvable:$true] %s107_s11  ;;  %s127_s22 = int_to_ptr.vmem [resolvable:$true] %s126_s22 }
  0x8a   :  { %s1754_s23 = scalar_lea.hbm %s2357_s12, 16 }
  0x8b   :  { %p1755_p11 = scmp.ne.s32.totalorder %s2357_s12, %s1754_s23  ;;  %p1758_p12 = scmp.lt.u32.totalorder %s1754_s23, %s2357_s12 }
  0x8d   :  { %p1760_p13 = pnand %p1758_p12, %p1755_p11 }
  0x8f   :  { %1763 = shalt.err (!%p1760_p13)
}
  0x90   :  { %s1764_s10 = scalar_lea.vmem %s108_s11, 16  ;;  %s1768_s27 = scalar_lea.vmem %s108_s11, 32 }
  0x91   :  { %p1765_p0 = scmp.ne.s32.totalorder %s108_s11, %s1764_s10  ;;  %p1769_p1 = scmp.lt.s32.totalorder %s108_s11, %s108_s11 }
  0x92   :  { %p1770_p2 = scmp.lt.s32.totalorder %s1768_s27, %s1764_s10 }
  0x94   :  { %p1771_p3 = por %p1770_p2, %p1769_p1 }
  0x96   :  { %p1772_p4 = pnand %p1771_p3, %p1765_p0 }
  0x98   :  { %1775 = shalt.err (!%p1772_p4)
}
  0x99   :  { %110 = dma.hbm_to_vmem [thread:$0]  %s2357_s12, 16, %s108_s11, [#allocation11]  }
  0x9a   :  { %s1776_s28 = scalar_lea.hbm %s2359_s14, 2048 }
  0x9b   :  { %p1777_p5 = scmp.ne.s32.totalorder %s2359_s14, %s1776_s28  ;;  %p1780_p6 = scmp.lt.u32.totalorder %s1776_s28, %s2359_s14 }
  0x9d   :  { %p1782_p7 = pnand %p1780_p6, %p1777_p5 }
  0x9f   :  { %1785 = shalt.err (!%p1782_p7)
}
  0xa0   :  { %s1786_s23 = scalar_lea.vmem %s127_s22, 2048  ;;  %p1791_p9 = scmp.lt.s32.totalorder %s127_s22, %s127_s22 }
  0xa1   :  { %p1787_p8 = scmp.ne.s32.totalorder %s127_s22, %s1786_s23  ;;  %p1792_p10 = scmp.lt.s32.totalorder %s1786_s23, %s1786_s23 }
  0xa3   :  { %p1793_p11 = por %p1792_p10, %p1791_p9 }
  0xa5   :  { %p1794_p12 = pnand %p1793_p11, %p1787_p8 }
  0xa7   :  { %1797 = shalt.err (!%p1794_p12)
}
  0xa8   :  { %132 = dma.hbm_to_vmem [thread:$0]  %s2359_s14, 2048, %s127_s22, [#allocation14], %s1882_s30, %s1882_s30, %s1883_s0  }
  0xa9   :  { %s1891_s25 = smov [#allocation18]   ;;  %s1892_s15 = smov [#allocation19]  }
  0xaa   :  { %s149_s26 = sshll.u32 %s1891_s25, 4  ;;  %s159_s2 = sshll.u32 %s1892_s15, 4  ;;  %s150_s26 = int_to_ptr.vmem [resolvable:$true] %s149_s26  ;;  %s160_s2 = int_to_ptr.vmem [resolvable:$true] %s159_s2 }
  0xab   :  { %s1798_s4 = scalar_lea.hbm %s2361_s16, 16 }
  0xac   :  { %p1799_p13 = scmp.ne.s32.totalorder %s2361_s16, %s1798_s4  ;;  %p1802_p0 = scmp.lt.u32.totalorder %s1798_s4, %s2361_s16 }
  0xae   :  { %p1804_p1 = pnand %p1802_p0, %p1799_p13 }
  0xb0   :  { %1807 = shalt.err (!%p1804_p1)
}
  0xb1   :  { %s1808_s14 = scalar_lea.vmem %s150_s26, 16  ;;  %s1812_s30 = scalar_lea.vmem %s150_s26, 32 }
  0xb2   :  { %p1809_p2 = scmp.ne.s32.totalorder %s150_s26, %s1808_s14  ;;  %p1813_p3 = scmp.lt.s32.totalorder %s150_s26, %s150_s26 }
  0xb3   :  { %p1814_p4 = scmp.lt.s32.totalorder %s1812_s30, %s1808_s14 }
  0xb5   :  { %p1815_p5 = por %p1814_p4, %p1813_p3 }
  0xb7   :  { %p1816_p6 = pnand %p1815_p5, %p1809_p2 }
  0xb9   :  { %1819 = shalt.err (!%p1816_p6)
}
  0xba   :  { %152 = dma.hbm_to_vmem [thread:$0]  %s2361_s16, 16, %s150_s26, [#allocation17]  }
  0xbb   :  { %s1820_s29 = scalar_lea.hbm %s2362_s17, 16 }
  0xbc   :  { %p1821_p7 = scmp.ne.s32.totalorder %s2362_s17, %s1820_s29  ;;  %p1824_p8 = scmp.lt.u32.totalorder %s1820_s29, %s2362_s17 }
  0xbe   :  { %p1826_p9 = pnand %p1824_p8, %p1821_p7 }
  0xc0   :  { %1829 = shalt.err (!%p1826_p9)
}
  0xc1   :  { %s1830_s25 = scalar_lea.vmem %s160_s2, 16  ;;  %s1834_s15 = scalar_lea.vmem %s160_s2, 32 }
  0xc2   :  { %p1831_p10 = scmp.ne.s32.totalorder %s160_s2, %s1830_s25  ;;  %p1835_p11 = scmp.lt.s32.totalorder %s160_s2, %s160_s2 }
  0xc3   :  { %p1836_p12 = scmp.lt.s32.totalorder %s1834_s15, %s1830_s25 }
  0xc5   :  { %p1837_p13 = por %p1836_p12, %p1835_p11 }
  0xc7   :  { %p1838_p0 = pnand %p1837_p13, %p1831_p10 }
  0xc9   :  { %1841 = shalt.err (!%p1838_p0)
}
  0xca   :  { %162 = dma.hbm_to_vmem [thread:$0]  %s2362_s17, 16, %s160_s2, [#allocation20]  }
  0xcb   :  { %1864 = dma.done.wait [#allocation5], 16  }
  0xcc   :  { %1865 = vsyncadd [#allocation5], 4294967280 }
  0xcd   :  { %1866 = dma.done.wait [#allocation3], 256  }
  0xce   :  { %1867 = vsyncadd [#allocation3], 4294967040 }
  0xcf   :  { %1868 = dma.done.wait [#allocation8], 2064  }
  0xd0   :  { %1869 = vsyncadd [#allocation8], 4294965232 }
  0xd1   :  { %1870 = dma.done.wait [#allocation11], 32  }
  0xd2   :  { %1871 = vsyncadd [#allocation11], 4294967264 }
  0xd3   :  { %1872 = dma.done.wait [#allocation14], 2064  }
  0xd4   :  { %1873 = vsyncadd [#allocation14], 4294965232 }
  0xd5   :  { %1874 = dma.done.wait [#allocation17], 32  }
  0xd6   :  { %1875 = vsyncadd [#allocation17], 4294967264 }
  0xd7   :  { %1876 = dma.done.wait [#allocation20], 16  }
  0xd8   :  { %1877 = vsyncadd [#allocation20], 4294967280 }
  0xd9   :  { %200 = sfence }
  0xda   :  { %s2375_s4 = sld [smem:[#allocation31_spill]]  ;;  %v1893_v2 = vmov 0   ;;  %v2149_v3 = vld [vmem:[#allocation6] sm:$0xff]  ;;  %v2157_v6 = vld [vmem:[#allocation6 + $0x8] sm:$0xff]  ;;  %v261_v10 = vld [vmem:[%s2350_s5 + $0x18] sm:$0xff]  ;;  %v201_v12 = vlaneseq  ;;  %vm332_vm0 = vcmask 130048  }
  0xdb   :  { %1601 = vset.pattern.permute.xlu1 %v1893_v2  ;;  %1600 = vset.pattern.permute.xlu0 %v1893_v2  ;;  %v1467_v7 = vpack.c.bf16 %v2157_v6, %v2149_v3  ;;  %v259_v8 = vld [vmem:[%s2350_s5 + $0x8] sm:$0xff]  ;;  %v258_v9 = vld [vmem:[%s2350_s5] sm:$0xff]  ;;  %v260_v11 = vld [vmem:[%s2350_s5 + $0x10] sm:$0xff]  ;;  %v1894_v16 = vmov 0.0   ;;  %s2376_s12 = sld [smem:[#allocation32_spill]]  ;;  %vm434_vm9 = vcmask 261120  }
  0xdc   :  { %v2173_v13 = vand.u32 127, %v201_v12  ;;  %v2199_v23 = vshrl.u32 %v201_v12, 7  ;;  %v272_v28 = vld [vmem:[#allocation7] sm:$0xff]  ;;  %v273_v29 = vld [vmem:[#allocation7 + $0x8] sm:$0xff]  ;;  %v274_v30 = vld [vmem:[#allocation7 + $0x10] sm:$0xff]  ;;  %vm1896_vm13 = vmmov 0  }
  0xdd   :  { %1468 = vmatprep.subr.bf16.mxu1 %v1467_v7  ;;  %v1479_v31 = vpack.c.bf16 %v273_v29, %v272_v28  ;;  %v275_v32 = vld [vmem:[#allocation7 + $0x18] sm:$0xff]  ;;  %v276_v34 = vld [vmem:[#allocation7 + $0x20] sm:$0xff]  ;;  %v277_v35 = vld [vmem:[#allocation7 + $0x28] sm:$0xff]  ;;  %s2379_s3 = sld [smem:[#allocation33_spill]]  ;;  %s1897_s30 = smov [#allocation21]  }
  0xde   :  { %1470 = vmatpush3.bf16.msra.mxu1 %v1467_v7  ;;  %v233_v24 = vadd.s32 8, %v2199_v23  ;;  %vm241_vm6 = vcmp.lt.s32.totalorder %v2173_v13, 32  ;;  %v1483_v33 = vpack.c.bf16 %v275_v32, %v274_v30  ;;  %v1487_v36 = vpack.c.bf16 %v277_v35, %v276_v34  ;;  %v278_v37 = vld [vmem:[#allocation7 + $0x30] sm:$0xff]  ;;  %v279_v38 = vld [vmem:[#allocation7 + $0x38] sm:$0xff]  ;;  %v280_v40 = vld [vmem:[#allocation7 + $0x40] sm:$0xff]  ;;  %s1184_s0 = sshll.u32 %s1897_s30, 4  ;;  %s1185_s0 = int_to_ptr.vmem [resolvable:$true] %s1184_s0 }
  0xdf   :  { %1480 = vmatprep.subr.bf16.mxu0 %v1479_v31  ;;  %v1491_v39 = vpack.c.bf16 %v279_v38, %v278_v37  ;;  %v281_v41 = vld [vmem:[#allocation7 + $0x48] sm:$0xff]  ;;  %v282_v43 = vld [vmem:[#allocation7 + $0x50] sm:$0xff]  ;;  %v283_v44 = vld [vmem:[#allocation7 + $0x58] sm:$0xff]  ;;  %p1847_p2 = scmp.lt.s32.totalorder %s1185_s0, %s1185_s0 }
  0xe0   :  { %v205_v0 = vld [vmem:[%s2375_s4 + $0x10] sm:$0xff]  ;;  %v203_v1 = vld [vmem:[%s2375_s4] sm:$0xff]  ;;  %v206_v4 = vld [vmem:[%s2375_s4 + $0x18] sm:$0xff]  ;;  %1482 = vmatpush3.bf16.msra.mxu0 %v1479_v31  ;;  %v1495_v42 = vpack.c.bf16 %v281_v41, %v280_v40  ;;  %v1499_v45 = vpack.c.bf16 %v283_v44, %v282_v43 }
  0xe1   :  { %214 = vperm.xlu1 %1601, %v205_v0   ;;  %208 = vperm.xlu0 %1600, %v203_v1   ;;  %v204_v5 = vld [vmem:[%s2375_s4 + $0x8] sm:$0xff]  ;;  %v1203_v25 = vld [vmem:[%s2376_s12] ss:$0 sm:$0xff]  ;;  %v284_v46 = vld [vmem:[#allocation7 + $0x60] sm:$0xff] }
  0xe2   :  { %vm239_vm5 = vcmp.eq.s32.totalorder %v2199_v23, %v1203_v25  ;;  %vm240_vm7 = vcmp.eq.s32.totalorder %v233_v24, %v1203_v25  ;;  %1484 = vmatprep.subr.bf16.mxu0 %v1483_v33  ;;  %v285_v47 = vld [vmem:[#allocation7 + $0x68] sm:$0xff]  ;;  %v1208_v51 = vld [vmem:[%s2351_s6] ss:$0 sm:$0xff]  ;;  %v287_v24 = vld [vmem:[#allocation7 + $0x78] sm:$0xff]  ;;  %s291_s6 = sld [smem:[#allocation2]] }
  0xe3   :  { %vm242_vm8 = vmand %vm239_vm5, %vm241_vm6  ;;  %v1503_v48 = vpack.c.bf16 %v285_v47, %v284_v46  ;;  %v1209_v55 = vld [vmem:[%s2352_s7] ss:$0 sm:$0xff] }
  0xe4   :  { %vm2207_vm10 = vmand %vm240_vm7, %vm241_vm6  ;;  %v2212_v27 = vsel %vm242_vm8, 1.0, %v1894_v16  ;;  %1486 = vmatpush3.bf16.msra.mxu0 %v1483_v33 }
  0xe5   :  { %217 = vperm.xlu1 %1601, %v206_v4   ;;  %211 = vperm.xlu0 %1600, %v204_v5  }
  0xe6   :  { %1488 = vmatprep.subr.bf16.mxu0 %v1487_v36 }
  0xe8   :  { %1490 = vmatpush3.bf16.msra.mxu0 %v1487_v36  ;;  %s516_s7 = sadd.f32 1.0, %s291_s6 }
  0xe9   :  { %299 = vperm.xlu1 %1601, %v259_v8   ;;  %294 = vperm.xlu0 %1600, %v258_v9  }
  0xea   :  { %1492 = vmatprep.subr.bf16.mxu0 %v1491_v39  ;;  %v517_v28 = vstv %s516_s7 }
  0xeb   :  { %v518_v29 = vmul.f32 %v517_v28, %v2149_v3  ;;  %v519_v26 = vmul.f32 %v517_v28, %v2157_v6 }
  0xec   :  { %1494 = vmatpush3.bf16.msra.mxu0 %v1491_v39 }
  0xed   :  { %309 = vperm.xlu1 %1601, %v261_v10   ;;  %304 = vperm.xlu0 %1600, %v260_v11  }
  0xee   :  { %1496 = vmatprep.subr.bf16.mxu0 %v1495_v42 }
  0xf0   :  { %1498 = vmatpush3.bf16.msra.mxu0 %v1495_v42 }
  0xf1   :  { %1500 = vmatprep.subr.bf16.mxu0 %v1499_v45 }
  0xf4   :  { %1502 = vmatpush3.bf16.msra.mxu0 %v1499_v45 }
  0xf5   :  { %1504 = vmatprep.subr.bf16.mxu0 %v1503_v48 }
  0xf8   :  { %1506 = vmatpush3.bf16.msra.mxu0 %v1503_v48 }
 0x160   :  { %v215_v14 = vpop.permute.xlu1 %214  ;;  %v209_v15 = vpop.permute.xlu0 %208 }
 0x161   :  { %vm219_vm1 = vcmp.eq.s32.totalorder %v2173_v13, %v209_v15  ;;  %vm221_vm2 = vcmp.eq.s32.totalorder %v2173_v13, %v215_v14 }
 0x162   :  { %v2178_v17 = vsel %vm219_vm1, 1.0, %v1894_v16  ;;  %v2183_v20 = vsel %vm221_vm2, 1.0, %v1894_v16  ;;  %vm254_vm2 = vcmp.lt.s32.totalorder %v2173_v13, 16 }
 0x163   :  { %1317 = vmatprep.mubr.msk.f32.mxu1 %vm332_vm0, %v2178_v17 }
 0x164   :  { %v218_v18 = vpop.permute.xlu1 %217  ;;  %v212_v19 = vpop.permute.xlu0 %211 }
 0x165   :  { %vm220_vm3 = vcmp.eq.s32.totalorder %v2173_v13, %v212_v19  ;;  %vm222_vm4 = vcmp.eq.s32.totalorder %v2173_v13, %v218_v18  ;;  %v2237_v18 = vsel %vm2207_vm10, 1.0, %v1894_v16  ;;  %v286_v19 = vld [vmem:[#allocation7 + $0x70] sm:$0xff] }
 0x166   :  { %v2187_v21 = vsel %vm220_vm3, 1.0, %v1894_v16  ;;  %v2195_v22 = vsel %vm222_vm4, 1.0, %v1894_v16  ;;  %v1507_v25 = vpack.c.bf16 %v287_v24, %v286_v19  ;;  %v1221_v24 = vld [vmem:[#allocation13] ss:$0 sm:$0xff]  ;;  %vm1164_vm4 = vcmp.lt.s32.totalorder %v2173_v13, 3 }
 0x167   :  { %1318 = vmatmul.mubr.msk.f32.vlgmr.msra.gmra.mrb[0].mxu1 %vm332_vm0, %v2187_v21 }
 0x168   :  { %1320 = vmatprep.mubr.msk.f32.mxu1 %vm332_vm0, %v2183_v20  ;;  %v2216_v49 = vpop.permute.xlu1 %299  ;;  %v2218_v50 = vpop.permute.xlu0 %294  ;;  %1508 = vmatprep.subr.bf16.mxu0 %v1507_v25 }
 0x169   :  { %v319_v52 = vmul.f32 %v1208_v51, %v2216_v49  ;;  %v318_v53 = vmul.f32 %v1208_v51, %v2218_v50  ;;  %1510 = vmatpush3.bf16.msra.mxu0 %v1507_v25 }
 0x16b   :  { %1321 = vmatmul.mubr.msk.f32.gmra.mrb[2].mxu1 %vm332_vm0, %v2195_v22  ;;  %v329_v58 = vadd.f32 %v1209_v55, %v319_v52  ;;  %v328_v61 = vadd.f32 %v1209_v55, %v318_v53 }
 0x16c   :  { %1331 = vmatprep.mubr.msk.f32.mxu1 %vm434_vm9, %v2212_v27  ;;  %v2225_v54 = vpop.permute.xlu1 %309  ;;  %v2230_v56 = vpop.permute.xlu0 %304 }
 0x16d   :  { %v321_v57 = vmul.f32 %v1208_v51, %v2225_v54  ;;  %v320_v59 = vmul.f32 %v1208_v51, %v2230_v56 }
 0x16f   :  { %v331_v2 = vadd.f32 %v1209_v55, %v321_v57  ;;  %v330_v7 = vadd.f32 %v1209_v55, %v320_v59 }
 0x23a   :  { %v1319_v60 = vpop.f32.mrb[0].mxu1 }
 0x23b   :  { %v417_v62 = vadd.f32 %v1319_v60, %v329_v58  ;;  %v411_v63 = vpop.f32.mrb[1].mxu1 }
 0x23c   :  { %v412_v0 = vadd.f32 %v411_v63, %v328_v61 }
 0x23d   :  { %v431_v1 = vmax.f32 %v417_v62, 0.0  ;;  %v1217_v62 = vld [vmem:[#allocation9] ss:$0 sm:$0xff] }
 0x23e   :  { %v430_v4 = vmax.f32 %v412_v0, 0.0  ;;  %v1322_v5 = vpop.f32.mrb[2].mxu1 }
 0x23f   :  { %v427_v8 = vadd.f32 %v1322_v5, %v331_v2  ;;  %v421_v9 = vpop.f32.mrb[3].mxu1 }
 0x240   :  { %v1471_v10 = vpack.c.bf16 %v431_v1, %v430_v4  ;;  %v422_v11 = vadd.f32 %v421_v9, %v330_v7  ;;  %v1218_v1 = vld [vmem:[#allocation10] ss:$0 sm:$0xff] }
 0x241   :  { %v433_v12 = vmax.f32 %v427_v8, 0.0 }
 0x242   :  { %v432_v14 = vmax.f32 %v422_v11, 0.0  ;;  %1472 = vmatprep.subr.bf16.mxu1 %v1471_v10 }
 0x243   :  { %1474 = vmatpush3.bf16.msra.mxu1 %v1471_v10 }
 0x244   :  { %v1475_v15 = vpack.c.bf16 %v433_v12, %v432_v14  ;;  %v1220_v14 = vld [vmem:[#allocation12] ss:$0 sm:$0xff] }
 0x245   :  { %v681_v19 = vmul.f32 %v1220_v14, %v2218_v50  ;;  %v684_v25 = vmul.f32 %v1220_v14, %v2225_v54  ;;  %v656_v54 = vld [vmem:[#allocation15 + $0x8] sm:$0xff] }
 0x246   :  { %1476 = vmatprep.subr.bf16.mxu1 %v1475_v15 }
 0x247   :  { %1478 = vmatpush3.bf16.msra.mxu1 %v1475_v15  ;;  %v682_v15 = vmul.f32 %v1220_v14, %v2216_v49 }
 0x249   :  { %v692_v28 = vadd.f32 %v1221_v24, %v682_v15  ;;  %v1074_v15 = vld [vmem:[%s2363_s18 + $0x18] sm:$0xff] }
 0x24a   :  { %1332 = vmatmul.mubr.msk.f32.vlgmr.msra.gmra.mrb[4].mxu1 %vm434_vm9, %v2237_v18 }
 0x24b   :  { %1373 = vmatprep.mubr.msk.f32.mxu1 %vm332_vm0, %v2178_v17  ;;  %v1216_v17 = vld [vmem:[%s2354_s9] ss:$0 sm:$0xff]  ;;  %s1219_s9 = sld [smem:[#allocation2 + $0x1]] }
 0x251   :  { %s859_s27 = sadd.f32 1.0, %s1219_s9 }
 0x31d   :  { %v1333_v30 = vpop.f32.mrb[4].mxu1 }
 0x31e   :  { %v507_v31 = vpop.f32.mrb[5].mxu1  ;;  %v521_v33 = vadd.f32 %v1333_v30, %v519_v26  ;;  %v691_v26 = vadd.f32 %v1221_v24, %v681_v19 }
 0x31f   :  { %v520_v32 = vadd.f32 %v518_v29, %v507_v31 }
 0x321   :  { %1366 = vmatprep.mubr.f32.mxu0 %v520_v32  ;;  %v694_v32 = vadd.f32 %v1221_v24, %v684_v25  ;;  %v1076_v25 = vld [vmem:[%s2363_s18 + $0x28] sm:$0xff] }
 0x322   :  { %1367 = vmatmul.mubr.f32.vlgmr.msra.gmra.mrb[0].mxu0 %v521_v33 }
 0x323   :  { %1464 = vmatprep.mubr.msk.f32.mxu0 %vm1896_vm13, %v1894_v16 }
 0x3f5   :  { %v1368_v34 = vpop.f32.mrb[0].mxu0 }
 0x3f6   :  { %v600_v35 = vadd.f32 %v1368_v34, %v1216_v17  ;;  %v594_v36 = vpop.f32.mrb[1].mxu0 }
 0x3f7   :  { %v595_v37 = vadd.f32 %v1216_v17, %v594_v36 }
 0x3f9   :  { %v605_v38 = vadd.f32 %v600_v35, %v595_v37 }
 0x3fb   :  { %v606_v39 = vrot.slane %v605_v38, 4 }
 0x3fd   :  { %v607_v40 = vadd.f32 %v606_v39, %v605_v38 }
 0x3ff   :  { %v608_v3 = vrot.slane %v607_v40, 2 }
 0x401   :  { %v609_v41 = vadd.f32 %v608_v3, %v607_v40  ;;  %v657_v40 = vld [vmem:[#allocation15 + $0x10] sm:$0xff]  ;;  %v658_v3 = vld [vmem:[#allocation15 + $0x18] sm:$0xff] }
 0x403   :  { %v610_v6 = vrot.slane %v609_v41, 1 }
 0x405   :  { %v611_v42 = vadd.f32 %v610_v6, %v609_v41  ;;  %v1527_v41 = vpack.c.bf16 %v658_v3, %v657_v40  ;;  %v659_v6 = vld [vmem:[#allocation15 + $0x20] sm:$0xff] }
 0x407   :  { %v612_v43 = vmul.f32 0.0625, %v611_v42  ;;  %v660_v42 = vld [vmem:[#allocation15 + $0x28] sm:$0xff] }
 0x409   :  { %v613_v44 = vsub.f32 %v595_v37, %v612_v43  ;;  %v614_v45 = vsub.f32 %v600_v35, %v612_v43  ;;  %v655_v37 = vld [vmem:[#allocation15] sm:$0xff]  ;;  %v1531_v43 = vpack.c.bf16 %v660_v42, %v659_v6 }
 0x40a   :  { %v1523_v39 = vpack.c.bf16 %v656_v54, %v655_v37 }
 0x40b   :  { %v617_v46 = vmul.f32 %v613_v44, %v613_v44  ;;  %v618_v47 = vmul.f32 %v614_v45, %v614_v45 }
 0x40d   :  { %v619_v48 = vadd.f32 %v618_v47, %v617_v46  ;;  %v663_v47 = vld [vmem:[#allocation15 + $0x40] sm:$0xff] }
 0x40f   :  { %v620_v51 = vrot.slane %v619_v48, 4 }
 0x411   :  { %v621_v52 = vadd.f32 %v620_v51, %v619_v48  ;;  %v664_v48 = vld [vmem:[#allocation15 + $0x48] sm:$0xff] }
 0x412   :  { %v1539_v51 = vpack.c.bf16 %v664_v48, %v663_v47 }
 0x413   :  { %v622_v53 = vrot.slane %v621_v52, 2 }
 0x415   :  { %v623_v55 = vadd.f32 %v622_v53, %v621_v52  ;;  %v665_v52 = vld [vmem:[#allocation15 + $0x50] sm:$0xff]  ;;  %v666_v53 = vld [vmem:[#allocation15 + $0x58] sm:$0xff] }
 0x417   :  { %v624_v57 = vrot.slane %v623_v55, 1 }
 0x419   :  { %v625_v58 = vadd.f32 %v624_v57, %v623_v55  ;;  %v1543_v55 = vpack.c.bf16 %v666_v53, %v665_v52  ;;  %v667_v57 = vld [vmem:[#allocation15 + $0x60] sm:$0xff] }
 0x41b   :  { %v626_v59 = vmul.f32 0.0625, %v625_v58 }
 0x41d   :  { %v627_v60 = vadd.f32 1e-05, %v626_v59  ;;  %v669_v59 = vld [vmem:[#allocation15 + $0x70] sm:$0xff] }
 0x41f   :  { %1602 = vrsqrt.f32 %v627_v60  ;;  %v670_v60 = vld [vmem:[#allocation15 + $0x78] sm:$0xff] }
 0x429   :  { %v1603_v61 = vpop.eup %1602 }
 0x42a   :  { %v629_v63 = vmul.f32 %v1603_v61, %v613_v44  ;;  %v630_v0 = vmul.f32 %v1603_v61, %v614_v45  ;;  %v661_v44 = vld [vmem:[#allocation15 + $0x30] sm:$0xff]  ;;  %v662_v45 = vld [vmem:[#allocation15 + $0x38] sm:$0xff]  ;;  %v1551_v61 = vpack.c.bf16 %v670_v60, %v669_v59 }
 0x42b   :  { %v1535_v46 = vpack.c.bf16 %v662_v45, %v661_v44 }
 0x42c   :  { %v637_v2 = vmul.f32 %v1217_v62, %v629_v63  ;;  %v638_v4 = vmul.f32 %v1217_v62, %v630_v0  ;;  %v860_v62 = vstv %s859_s27 }
 0x42e   :  { %v645_v5 = vadd.f32 %v1218_v1, %v637_v2  ;;  %v646_v7 = vadd.f32 %v1218_v1, %v638_v4 }
 0x430   :  { %vm647_vm11 = vcmp.ge.f32.partialorder %v645_v5, 0.0  ;;  %vm648_vm12 = vcmp.ge.f32.partialorder %v646_v7, 0.0  ;;  %v649_v8 = vmul.f32 0.01, %v645_v5  ;;  %v650_v9 = vmul.f32 0.01, %v646_v7 }
 0x432   :  { %v2248_v10 = vsel %vm647_vm11, %v645_v5, %v649_v8  ;;  %v2250_v11 = vsel %vm648_vm12, %v646_v7, %v650_v9  ;;  %v1895_v7 = vmov 0.0|0.0   ;;  %v1071_v8 = vld [vmem:[%s2363_s18] sm:$0xff]  ;;  %v1072_v9 = vld [vmem:[%s2363_s18 + $0x8] sm:$0xff] }
 0x433   :  { %v1511_v12 = vpack.c.bf16 %v2250_v11, %v2248_v10  ;;  %v861_v0 = vmul.f32 %v860_v62, %v2248_v10  ;;  %v862_v1 = vmul.f32 %v860_v62, %v2250_v11  ;;  %1558 = vmatprep.subr.bf16.mxu0 %v1895_v7  ;;  %v1229_v62 = vld [vmem:[#allocation18] ss:$0 sm:$0xff] }
 0x435   :  { %1512 = vmatprep.subr.bf16.mxu1 %v1511_v12 }
 0x436   :  { %1514 = vmatpush3.bf16.msra.mxu1 %v1511_v12  ;;  %v1073_v12 = vld [vmem:[%s2363_s18 + $0x10] sm:$0xff] }
 0x437   :  { %v1562_v19 = vpack.c.bf16 %v1074_v15, %v1073_v12 }
 0x439   :  { %1374 = vmatmul.mubr.msk.f32.vlgmr.msra.gmra.mrb[6].mxu1 %vm332_vm0, %v2187_v21  ;;  %v683_v21 = vmul.f32 %v1220_v14, %v2230_v56  ;;  %v1559_v14 = vpack.c.bf16 %v1072_v9, %v1071_v8  ;;  %v1206_v8 = vld [vmem:[%s2379_s3] ss:$0 sm:$0xff] }
 0x43a   :  { %1376 = vmatprep.mubr.msk.f32.mxu1 %vm332_vm0, %v2183_v20  ;;  %vm253_vm1 = vcmp.eq.s32.totalorder %v2199_v23, %v1206_v8  ;;  %v1232_v23 = vld [vmem:[%s2364_s19] ss:$0 sm:$0xff]  ;;  %s1842_s19 = scalar_lea.vmem %s1185_s0, 128 }
 0x43b   :  { %v693_v17 = vadd.f32 %v1221_v24, %v683_v21  ;;  %1560 = vmatpush3.bf16.msra.mxu0 %v1559_v14  ;;  %v1075_v24 = vld [vmem:[%s2363_s18 + $0x20] sm:$0xff]  ;;  %v1077_v21 = vld [vmem:[%s2363_s18 + $0x30] sm:$0xff]  ;;  %vm255_vm3 = vmand %vm253_vm1, %vm254_vm2  ;;  %p1843_p1 = scmp.ne.s32.totalorder %s1185_s0, %s1842_s19  ;;  %p1848_p3 = scmp.lt.s32.totalorder %s1842_s19, %s1842_s19 }
 0x43c   :  { %1561 = vmatprep.subr.bf16.mxu0 %v1895_v7 }
 0x43d   :  { %1377 = vmatmul.mubr.msk.f32.gmra.mrb[8].mxu1 %vm332_vm0, %v2195_v22  ;;  %p1849_p4 = por %p1848_p3, %p1847_p2 }
 0x43e   :  { %1387 = vmatprep.mubr.msk.f32.mxu1 %vm434_vm9, %v2212_v27 }
 0x43f   :  { %1563 = vmatpush3.bf16.msra.mxu0 %v1562_v19  ;;  %p1850_p5 = pnand %p1849_p4, %p1843_p1 }
 0x440   :  { %1564 = vmatprep.subr.bf16.mxu0 %v1895_v7 }
 0x50c   :  { %v1375_v29 = vpop.f32.mrb[6].mxu1 }
 0x50d   :  { %v767_v20 = vadd.f32 %v1375_v29, %v692_v28  ;;  %v761_v30 = vpop.f32.mrb[7].mxu1  ;;  %v1565_v28 = vpack.c.bf16 %v1076_v25, %v1075_v24  ;;  %v1078_v29 = vld [vmem:[%s2363_s18 + $0x38] sm:$0xff] }
 0x50e   :  { %v762_v31 = vadd.f32 %v761_v30, %v691_v26  ;;  %v1568_v26 = vpack.c.bf16 %v1078_v29, %v1077_v21  ;;  %v1080_v30 = vld [vmem:[%s2363_s18 + $0x48] sm:$0xff] }
 0x50f   :  { %v781_v22 = vmax.f32 %v767_v20, 0.0  ;;  %1566 = vmatpush3.bf16.msra.mxu0 %v1565_v28  ;;  %v1079_v20 = vld [vmem:[%s2363_s18 + $0x40] sm:$0xff]  ;;  %v1207_v28 = vsel %vm255_vm3, 1.0, %v1894_v16 }
 0x510   :  { %v780_v33 = vmax.f32 %v762_v31, 0.0  ;;  %v1378_v27 = vpop.f32.mrb[8].mxu1  ;;  %1567 = vmatprep.subr.bf16.mxu0 %v1895_v7  ;;  %v1571_v31 = vpack.c.bf16 %v1080_v30, %v1079_v20 }
 0x511   :  { %v777_v34 = vadd.f32 %v1378_v27, %v694_v32  ;;  %v771_v49 = vpop.f32.mrb[9].mxu1  ;;  %v1082_v32 = vld [vmem:[%s2363_s18 + $0x58] sm:$0xff]  ;;  %v1083_v27 = vld [vmem:[%s2363_s18 + $0x60] sm:$0xff] }
 0x512   :  { %v1515_v35 = vpack.c.bf16 %v781_v22, %v780_v33  ;;  %v772_v50 = vadd.f32 %v771_v49, %v693_v17  ;;  %v1081_v22 = vld [vmem:[%s2363_s18 + $0x50] sm:$0xff]  ;;  %v1084_v17 = vld [vmem:[%s2363_s18 + $0x68] sm:$0xff] }
 0x513   :  { %v783_v36 = vmax.f32 %v777_v34, 0.0  ;;  %1569 = vmatpush3.bf16.msra.mxu0 %v1568_v26  ;;  %v1574_v33 = vpack.c.bf16 %v1082_v32, %v1081_v22  ;;  %v1577_v34 = vpack.c.bf16 %v1084_v17, %v1083_v27  ;;  %v1085_v49 = vld [vmem:[%s2363_s18 + $0x70] sm:$0xff] }
 0x514   :  { %v782_v38 = vmax.f32 %v772_v50, 0.0  ;;  %1516 = vmatprep.subr.bf16.mxu1 %v1515_v35  ;;  %1570 = vmatprep.subr.bf16.mxu0 %v1895_v7 }
 0x515   :  { %1518 = vmatpush3.bf16.msra.mxu1 %v1515_v35  ;;  %v1086_v35 = vld [vmem:[%s2363_s18 + $0x78] sm:$0xff] }
 0x516   :  { %v1519_v56 = vpack.c.bf16 %v783_v36, %v782_v38  ;;  %v1580_v50 = vpack.c.bf16 %v1086_v35, %v1085_v49  ;;  %v1228_v36 = vld [vmem:[#allocation16] ss:$0 sm:$0xff] }
 0x517   :  { %1572 = vmatpush3.bf16.msra.mxu0 %v1571_v31 }
 0x518   :  { %1520 = vmatprep.subr.bf16.mxu1 %v1519_v56  ;;  %1573 = vmatprep.subr.bf16.mxu0 %v1895_v7 }
 0x519   :  { %1522 = vmatpush3.bf16.msra.mxu1 %v1519_v56 }
 0x51a   :  { %1524 = vmatprep.subr.bf16.mxu1 %v1523_v39 }
 0x51b   :  { %1575 = vmatpush3.bf16.msra.mxu0 %v1574_v33 }
 0x51c   :  { %1388 = vmatmul.mubr.msk.f32.vlgmr.msra.gmra.mrb[10].mxu1 %vm434_vm9, %v2237_v18  ;;  %v668_v18 = vld [vmem:[#allocation15 + $0x68] sm:$0xff]  ;;  %1576 = vmatprep.subr.bf16.mxu0 %v1895_v7 }
 0x51d   :  { %1526 = vmatpush3.bf16.msra.mxu1 %v1523_v39  ;;  %v1547_v58 = vpack.c.bf16 %v668_v18, %v667_v57 }
 0x51e   :  { %1528 = vmatprep.subr.bf16.mxu1 %v1527_v41 }
 0x51f   :  { %1578 = vmatpush3.bf16.msra.mxu0 %v1577_v34 }
 0x520   :  { %1579 = vmatprep.subr.bf16.mxu0 %v1895_v7 }
 0x521   :  { %1530 = vmatpush3.bf16.msra.mxu1 %v1527_v41 }
 0x522   :  { %1532 = vmatprep.subr.bf16.mxu1 %v1531_v43 }
 0x523   :  { %1581 = vmatpush3.bf16.msra.mxu0 %v1580_v50 }
 0x525   :  { %1534 = vmatpush3.bf16.msra.mxu1 %v1531_v43 }
 0x526   :  { %1536 = vmatprep.subr.bf16.mxu1 %v1535_v46 }
 0x529   :  { %1538 = vmatpush3.bf16.msra.mxu1 %v1535_v46 }
 0x52a   :  { %1540 = vmatprep.subr.bf16.mxu1 %v1539_v51 }
 0x52d   :  { %1542 = vmatpush3.bf16.msra.mxu1 %v1539_v51 }
 0x52e   :  { %1544 = vmatprep.subr.bf16.mxu1 %v1543_v55 }
 0x531   :  { %1546 = vmatpush3.bf16.msra.mxu1 %v1543_v55 }
 0x532   :  { %1548 = vmatprep.subr.bf16.mxu1 %v1547_v58 }
 0x535   :  { %1550 = vmatpush3.bf16.msra.mxu1 %v1547_v58 }
 0x536   :  { %1552 = vmatprep.subr.bf16.mxu1 %v1551_v61 }
 0x539   :  { %1554 = vmatpush3.bf16.msra.mxu1 %v1551_v61 }
 0x53a   :  { %1555 = vmatprep.subr.bf16.mxu1 %v1895_v7 }
 0x5ef   :  { %v1389_v63 = vpop.f32.mrb[10].mxu1 }
 0x5f0   :  { %v850_v2 = vpop.f32.mrb[11].mxu1  ;;  %v864_v5 = vadd.f32 %v1389_v63, %v862_v1  ;;  %v1230_v1 = vld [vmem:[#allocation19] ss:$0 sm:$0xff] }
 0x5f1   :  { %v863_v4 = vadd.f32 %v861_v0, %v850_v2 }
 0x5f3   :  { %1422 = vmatprep.mubr.f32.mxu1 %v863_v4 }
 0x5f4   :  { %1423 = vmatmul.mubr.f32.vlgmr.msra.gmra.mrb[12].mxu1 %v864_v5 }
 0x5f5   :  { %1429 = vmatprep.mubr.msk.f32.mxu1 %vm1896_vm13, %v1894_v16 }
 0x6c7   :  { %v1424_v37 = vpop.f32.mrb[12].mxu1 }
 0x6c8   :  { %v943_v54 = vadd.f32 %v1424_v37, %v1228_v36  ;;  %v937_v38 = vpop.f32.mrb[13].mxu1 }
 0x6c9   :  { %v938_v56 = vadd.f32 %v1228_v36, %v937_v38 }
 0x6cb   :  { %v948_v39 = vadd.f32 %v943_v54, %v938_v56 }
 0x6cd   :  { %v949_v40 = vrot.slane %v948_v39, 4 }
 0x6cf   :  { %v950_v3 = vadd.f32 %v949_v40, %v948_v39 }
 0x6d1   :  { %v951_v41 = vrot.slane %v950_v3, 2 }
 0x6d3   :  { %v952_v6 = vadd.f32 %v951_v41, %v950_v3 }
 0x6d5   :  { %v953_v42 = vrot.slane %v952_v6, 1 }
 0x6d7   :  { %v954_v43 = vadd.f32 %v953_v42, %v952_v6 }
 0x6d9   :  { %v955_v44 = vmul.f32 0.0625, %v954_v43 }
 0x6db   :  { %v956_v45 = vsub.f32 %v938_v56, %v955_v44  ;;  %v957_v46 = vsub.f32 %v943_v54, %v955_v44 }
 0x6dd   :  { %v960_v47 = vmul.f32 %v956_v45, %v956_v45  ;;  %v961_v48 = vmul.f32 %v957_v46, %v957_v46 }
 0x6df   :  { %v962_v51 = vadd.f32 %v961_v48, %v960_v47 }
 0x6e1   :  { %v963_v52 = vrot.slane %v962_v51, 4 }
 0x6e3   :  { %v964_v53 = vadd.f32 %v963_v52, %v962_v51 }
 0x6e5   :  { %v965_v55 = vrot.slane %v964_v53, 2 }
 0x6e7   :  { %v966_v57 = vadd.f32 %v965_v55, %v964_v53 }
 0x6e9   :  { %v967_v18 = vrot.slane %v966_v57, 1 }
 0x6eb   :  { %v968_v58 = vadd.f32 %v967_v18, %v966_v57 }
 0x6ed   :  { %v969_v59 = vmul.f32 0.0625, %v968_v58 }
 0x6ef   :  { %v970_v60 = vadd.f32 1e-05, %v969_v59 }
 0x6f1   :  { %1604 = vrsqrt.f32 %v970_v60 }
 0x6fb   :  { %v1605_v61 = vpop.eup %1604 }
 0x6fc   :  { %v972_v63 = vmul.f32 %v1605_v61, %v956_v45  ;;  %v973_v0 = vmul.f32 %v1605_v61, %v957_v46 }
 0x6fe   :  { %v980_v2 = vmul.f32 %v1229_v62, %v972_v63  ;;  %v981_v4 = vmul.f32 %v1229_v62, %v973_v0 }
 0x700   :  { %v988_v5 = vadd.f32 %v1230_v1, %v980_v2  ;;  %v989_v7 = vadd.f32 %v1230_v1, %v981_v4 }
 0x702   :  { %v992_v9 = vmul.f32 0.01, %v988_v5  ;;  %vm990_vm14 = vcmp.ge.f32.partialorder %v988_v5, 0.0  ;;  %vm991_vm15 = vcmp.ge.f32.partialorder %v989_v7, 0.0  ;;  %v993_v12 = vmul.f32 0.01, %v989_v7 }
 0x704   :  { %v994_v14 = vsel %vm990_vm14, %v988_v5, %v992_v9  ;;  %v995_v15 = vsel %vm991_vm15, %v989_v7, %v993_v12 }
 0x705   :  { %v996_v19 = vadd.f32 %v994_v14, %v2248_v10  ;;  %v997_v24 = vadd.f32 %v995_v15, %v2250_v11 }
 0x707   :  { %v1556_v25 = vpack.c.bf16 %v997_v24, %v996_v19 }
 0x709   :  { %1557 = vmatpush3.bf16.msra.mxu1 %v1556_v25 }
 0x70c   :  { %1430 = vmatmul.mubr.msk.f32.vlgmr.msra.gmra.mrb[14].mxu1 %vm332_vm0, %v1207_v28 }
 0x7df   :  { %v1067_v21 = vpop.f32.mrb[14].mxu1 }
 0x7e0   :  { %v1431_v29 = vpop.f32.mrb[15].mxu1  ;;  %1465 = vmatmul.mubr.f32.vlgmr.msra.gmra.mrb[2].mxu0 %v1067_v21 }
 0x8b3   :  { %v1160_v26 = vpop.f32.mrb[2].mxu0 }
 0x8b4   :  { %v1161_v10 = vadd.f32 %v1232_v23, %v1160_v26  ;;  %v1466_v20 = vpop.f32.mrb[3].mxu0 }
 0x8b6   :  { %v1165_v11 = vsel %vm1164_vm4, %v1161_v10, -1e+30 }
 0x8b7   :  { %1166 = vmax.xlane.f32.xlu0 %v1165_v11 }
 0x944   :  { %v1167_v30 = vpop.xlane.xlu0 %1166 }
 0x945   :  { %v1168_v31 = vsub.f32 %v1165_v11, %v1167_v30 }
 0x947   :  { %v1169_v22 = vmul.f32 1.442695, %v1168_v31 }
 0x949   :  { %1606 = vpow2.f32 %v1169_v22 }
 0x953   :  { %v1607_v16 = vpop.eup %1606 }
 0x954   :  { %1171 = vadd.xlane.f32.xlu1 %v1607_v16 }
 0x9e1   :  { %v1172_v32 = vpop.xlane.xlu1 %1171 }
 0x9e2   :  { %1608 = vlog2.f32 %v1172_v32 }
 0x9ec   :  { %v1609_v33 = vpop.eup %1608 }
 0x9ed   :  { %v1174_v27 = vmul.f32 0.6931472, %v1609_v33 }
 0x9ef   :  { %v1175_v17 = vadd.f32 %v1174_v27, %v1167_v30 }
 0x9f1   :  { %v1176_v34 = vsub.f32 %v1165_v11, %v1175_v17 }
 0x9f3   :  { %1177 = vst [vmem:[#allocation21] sm:$0xff] %v1176_v34 }
 0x9f4   :  { %1853 = shalt.err (!%p1850_p5)
}
 0x9f5   :  { %s1854_s24 = scalar_lea.hbm %s2365_s20, 128 }
 0x9f6   :  { %p1855_p6 = scmp.ne.s32.totalorder %s2365_s20, %s1854_s24  ;;  %p1858_p7 = scmp.lt.u32.totalorder %s1854_s24, %s2365_s20 }
 0x9f8   :  { %p1860_p8 = pnand %p1858_p7, %p1855_p6 }
 0x9fa   :  { %1863 = shalt.err (!%p1860_p8)
}
 0x9fb   :  { %1187 = dma.vmem_to_hbm [thread:$0]  %s1185_s0, 128, %s2365_s20, [#allocation4]  }
 0x9fc   :  { %1878 = dma.done.wait [#allocation4], 128  }
 0x9fd   :  { %1879 = vsyncadd [#allocation4], 4294967168 }
 0x9fe   :  { %1191 = vsyncpa [#allocation3], 1 }
 0x9ff   :  { %1192 = vsyncpa [#allocation8], 1 }
 0xa00   :  { %1193 = vsyncpa [#allocation11], 1 }
 0xa01   :  { %1194 = vsyncpa [#allocation14], 1 }
 0xa02   :  { %1195 = vsyncpa [#allocation17], 1 }
 0xa03   :  { %1196 = vsyncpa [#allocation20], 1 }
 0xa04   :  { %1197 = vsyncpa [#allocation4], 1 }
 0xa05   :  { %1198 = vsyncpa [#allocation5], 1 }

</bundles_post_ra>
